<compile_context>
chip_gen: v6e
topology: v6e:2x2x1
jax: 0.10.0
libtpu: 0.0.40
codegen_flags: <defaults>
</compile_context>

<pallas_src>
import jax
import jax.numpy as jnp
from jax.experimental import pallas as pl
from jax.experimental.pallas import tpu as pltpu

LANES = 128
SUBLANES = 8
VMEM_LIMIT_BYTES = 32 << 20   # <= physical VMEM on v5e/v6e (128 MiB) and v7x (64 MiB)


def _pick_max_tile_rows():
    """Generation-aware tile height.  Block bytes = tile_rows * 128 * 4."""
    try:
        kind = jax.devices()[0].device_kind.lower()
    except Exception:
        return 4096
    if "v5" in kind or "v4" in kind:
        # v5e: keep 2 inputs x 2 buffers x 2 MiB = 8 MiB well inside scoped VMEM.
        return 4096
    # v6e / v7x: 4 MiB blocks -> 16 MiB of double-buffered input, < 32 MiB limit.
    return 8192


def _make_mse_kernel(tile_rows, acc_rows, rows_valid, inner_steps, needs_mask,
                     two_axes):
    """Builds the kernel with all shape/grid constants baked in statically."""

    def kernel(pred_ref, tgt_ref, out_ref, acc_ref):
        if two_axes:
            p = pl.program_id(0)   # split axis (v7x TC sharding)
            i = pl.program_id(1)   # reduction axis
        else:
            p = 0
            i = pl.program_id(0)   # reduction axis only

        @pl.when(i == 0)
        def _():
            acc_ref[...] = jnp.zeros_like(acc_ref)

        # Cast only after load (v5e VPU has no bf16 math; cast is hidden under DMA).
        d = pred_ref[...].astype(jnp.float32) - tgt_ref[...].astype(jnp.float32)

        if needs_mask:
            # Only the last global block is partial; zero garbage rows of the
            # difference BEFORE squaring (robust to NaN/Inf padding).
            b = p * inner_steps + i
            local = jax.lax.broadcasted_iota(jnp.int32, (tile_rows, LANES), 0)
            d = jnp.where(b * tile_rows + local < rows_valid, d, 0.0)

        d2 = d * d
        # VPU-only accumulation: leading-axis sum over sublane groups is plain
        # vector adds into a few-vreg accumulator (acc_rows=32 shortens the
        # dependent-add chain 4x on large tiles; latency hygiene for v7x).
        acc_ref[...] += jnp.sum(
            d2.reshape(tile_rows // acc_rows, acc_rows, LANES), axis=0)

        @pl.when(i == inner_steps - 1)
        def _():
            out_ref[...] = acc_ref[...]

    return kernel


def cam_loss_regressor_forward(binary_output, regression_output,
                               binary_target, regression_target,
                               num_splits=1):
    """Matches CamLossRegressor.forward: scalar MSE of the regression pair.

    binary_output / binary_target are accepted (API parity) and unused,
    exactly like the PyTorch module.  `num_splits` > 1 is only meaningful on
    multi-TensorCore parts (v7x) and is applied only when it divides the block
    count exactly (no phantom blocks / duplicated DMA).
    """
    del binary_output, binary_target  # unused in the reference forward

    n_valid = regression_output.size
    pred = regression_output.reshape(-1)
    tgt = regression_target.reshape(-1)

    rows = n_valid // LANES
    rem = n_valid - rows * LANES

    # Ragged lane tail (< 128 elements): O(128) fix-up in XLA instead of a
    # full-tensor jnp.pad (which would cost ~2 extra HBM reads + 2 writes).
    tail_sum = jnp.float32(0.0)
    if rem:
        td = (pred[rows * LANES:].astype(jnp.float32)
              - tgt[rows * LANES:].astype(jnp.float32))
        tail_sum = jnp.sum(td * td)

    if rows == 0:
        # Tensor smaller than one lane row: nothing for the kernel to do.
        return (tail_sum / jnp.float32(n_valid)).astype(jnp.float32)

    if rem:
        pred_body = jax.lax.slice(pred, (0,), (rows * LANES,))
        tgt_body = jax.lax.slice(tgt, (0,), (rows * LANES,))
    else:
        pred_body, tgt_body = pred, tgt
    pred2d = pred_body.reshape(rows, LANES)
    tgt2d = tgt_body.reshape(rows, LANES)

    # Tile sizing: as large as possible (generation-aware cap), multiple of 8.
    max_tile_rows = _pick_max_tile_rows()
    tile_rows = min(max_tile_rows,
                    ((rows + SUBLANES - 1) // SUBLANES) * SUBLANES)
    num_blocks = pl.cdiv(rows, tile_rows)

    # Exact split only (no phantom blocks, no clamped index_map): fall back to
    # the single-core path when the split does not divide the block count.
    if num_splits > 1 and num_blocks % num_splits != 0:
        num_splits = 1
    inner_steps = num_blocks // num_splits
    # Mask needed only if the last block has garbage (row tail / oversized block).
    needs_mask = (num_blocks * tile_rows) != rows

    # Wider accumulator (4 vregs) when the tile allows it.
    acc_rows = 32 if tile_rows % 32 == 0 else SUBLANES

    two_axes = num_splits > 1
    kernel = _make_mse_kernel(tile_rows, acc_rows, rows, inner_steps,
                              needs_mask, two_axes)

    if two_axes:
        grid = (num_splits, inner_steps)
        in_map = lambda p, i: (p * inner_steps + i, 0)
        out_map = lambda p, i: (p, 0)
        # v7x: actually shard the split axis across TensorCores.
        dim_sem = (pltpu.CORE_PARALLEL, "arbitrary")
    else:
        grid = (inner_steps,)
        in_map = lambda i: (i, 0)
        out_map = lambda i: (0, 0)
        dim_sem = ("arbitrary",)

    itemsize = jnp.dtype(regression_output.dtype).itemsize
    cost = pl.CostEstimate(
        flops=3 * rows * LANES,
        transcendentals=0,
        bytes_accessed=2 * rows * LANES * itemsize
        + num_splits * acc_rows * LANES * 4,
    )

    partials = pl.pallas_call(
        kernel,
        out_shape=jax.ShapeDtypeStruct((num_splits * acc_rows, LANES),
                                       jnp.float32),
        grid_spec=pltpu.PrefetchScalarGridSpec(
            num_scalar_prefetch=0,
            grid=grid,
            in_specs=[
                pl.BlockSpec((tile_rows, LANES), in_map),
                pl.BlockSpec((tile_rows, LANES), in_map),
            ],
            # Each split writes its own accumulator tile -> no tile sharing.
            out_specs=pl.BlockSpec((acc_rows, LANES), out_map),
            scratch_shapes=[pltpu.VMEM((acc_rows, LANES), jnp.float32)],
        ),
        compiler_params=pltpu.CompilerParams(
            dimension_semantics=dim_sem,
            vmem_limit_bytes=VMEM_LIMIT_BYTES,
        ),
        cost_estimate=cost,
    )(pred2d, tgt2d)

    # Tiny final cross-lane reduce of the vreg partials (+ lane tail) and mean.
    total = jnp.sum(partials) + tail_sum
    return (total / jnp.float32(n_valid)).astype(jnp.float32)


def _reference(regression_output, regression_target):
    d = (regression_output.astype(jnp.float32)
         - regression_target.astype(jnp.float32))
    return jnp.mean(d * d)


if __name__ == "__main__":
    key = jax.random.PRNGKey(0)
    k1, k2, k3, k4 = jax.random.split(key, 4)

    # Small shapes consistent with a CAM-style head: NCHW regression maps and
    # per-image binary logits (binary pair unused, as in the PyTorch module).
    B, C, H, W = 2, 4, 16, 16
    binary_output = jax.random.normal(k1, (B, 1), dtype=jnp.float32)
    binary_target = jax.random.bernoulli(k2, 0.5, (B, 1)).astype(jnp.float32)
    regression_output = jax.random.normal(k3, (B, C, H, W), dtype=jnp.float32)
    regression_target = jax.random.normal(k4, (B, C, H, W), dtype=jnp.float32)

    loss_fn = jax.jit(cam_loss_regressor_forward)
    loss = jax.block_until_ready(
        loss_fn(binary_output, regression_output, binary_target,
                regression_target))

    ref = _reference(regression_output, regression_target)
    assert jnp.allclose(loss, ref, rtol=1e-5, atol=1e-5), (loss, ref)

    print("KERNEL_OK")
</pallas_src>

<mosaic_0001>
module attributes {stable_mosaic.version = 11 : i64} {
  func.func @kernel(%arg0: i32, %arg1: memref<16x128xf32, #tpu.memory_space<vmem>>, %arg2: memref<16x128xf32, #tpu.memory_space<vmem>>, %arg3: memref<8x128xf32, #tpu.memory_space<vmem>>, %arg4: memref<8x128xf32, #tpu.memory_space<vmem>>) attributes {dimension_semantics = [#tpu.dimension_semantics<arbitrary>], iteration_bounds = array<i64: 1>, scalar_prefetch = 0 : i64, scratch_operands = 1 : i64, tpu.core_type = #tpu.core_type<tc>, window_params = [{transform_indices = @transform_0, window_bounds = array<i64: 16, 128>}, {transform_indices = @transform_1, window_bounds = array<i64: 16, 128>}, {pipeline_mode = #tpu.pipeline_mode<synchronous>, transform_indices = @transform_2, window_bounds = array<i64: 8, 128>}]} {
    %c0_i32 = arith.constant 0 : i32
    %0 = arith.cmpi eq, %arg0, %c0_i32 : i32
    %1 = arith.extui %0 : i1 to i32
    %c0_i32_0 = arith.constant 0 : i32
    %2 = arith.cmpi ne, %1, %c0_i32_0 : i32
    scf.if %2 {
      %cst_10 = arith.constant 0.000000e+00 : f32
      %15 = vector.broadcast %cst_10 : f32 to vector<8x128xf32>
      %c0_11 = arith.constant 0 : index
      %c0_12 = arith.constant 0 : index
      %16 = vector.load %arg4[%c0_11, %c0_12] : memref<8x128xf32, #tpu.memory_space<vmem>>, vector<8x128xf32>
      tpu.vector_store %arg4[%c0_11, %c0_12], %15 {strides = array<i32>} : memref<8x128xf32, #tpu.memory_space<vmem>>, vector<8x128xf32>,
    } else {
    }
    %c0 = arith.constant 0 : index
    %c0_1 = arith.constant 0 : index
    %3 = vector.load %arg1[%c0, %c0_1] : memref<16x128xf32, #tpu.memory_space<vmem>>, vector<16x128xf32>
    %c0_2 = arith.constant 0 : index
    %c0_3 = arith.constant 0 : index
    %4 = vector.load %arg2[%c0_2, %c0_3] : memref<16x128xf32, #tpu.memory_space<vmem>>, vector<16x128xf32>
    %5 = arith.subf %3, %4 : vector<16x128xf32>
    %6 = arith.mulf %5, %5 : vector<16x128xf32>
    %c0_4 = arith.constant 0 : index
    %c0_5 = arith.constant 0 : index
    %7 = vector.load %arg4[%c0_4, %c0_5] : memref<8x128xf32, #tpu.memory_space<vmem>>, vector<8x128xf32>
    %8 = vector.shape_cast %6 : vector<16x128xf32> to vector<2x8x128xf32>
    %cst = arith.constant dense<0.000000e+00> : vector<8x128xf32>
    %9 = vector.multi_reduction <add>, %8, %cst [0] : vector<2x8x128xf32> to vector<8x128xf32>
    %10 = arith.addf %7, %9 : vector<8x128xf32>
    %c0_6 = arith.constant 0 : index
    %c0_7 = arith.constant 0 : index
    %11 = vector.load %arg4[%c0_6, %c0_7] : memref<8x128xf32, #tpu.memory_space<vmem>>, vector<8x128xf32>
    tpu.vector_store %arg4[%c0_6, %c0_7], %10 {strides = array<i32>} : memref<8x128xf32, #tpu.memory_space<vmem>>, vector<8x128xf32>,
    %c0_i32_8 = arith.constant 0 : i32
    %12 = arith.cmpi eq, %arg0, %c0_i32_8 : i32
    %13 = arith.extui %12 : i1 to i32
    %c0_i32_9 = arith.constant 0 : i32
    %14 = arith.cmpi ne, %13, %c0_i32_9 : i32
    scf.if %14 {
      %c0_10 = arith.constant 0 : index
      %c0_11 = arith.constant 0 : index
      %15 = vector.load %arg4[%c0_10, %c0_11] : memref<8x128xf32, #tpu.memory_space<vmem>>, vector<8x128xf32>
      %c0_12 = arith.constant 0 : index
      %c0_13 = arith.constant 0 : index
      %16 = vector.load %arg3[%c0_12, %c0_13] : memref<8x128xf32, #tpu.memory_space<vmem>>, vector<8x128xf32>
      tpu.vector_store %arg3[%c0_12, %c0_13], %15 {strides = array<i32>} : memref<8x128xf32, #tpu.memory_space<vmem>>, vector<8x128xf32>,
    } else {
    }
    return
  }
  func.func @transform_0(%arg0: i32) -> (i32, i32) {
    %c0_i32 = arith.constant 0 : i32
    %c0_i32_0 = arith.constant 0 : i32
    return %arg0, %c0_i32 : i32, i32
  }
  func.func @transform_1(%arg0: i32) -> (i32, i32) {
    %c0_i32 = arith.constant 0 : i32
    %c0_i32_0 = arith.constant 0 : i32
    return %arg0, %c0_i32 : i32, i32
  }
  func.func @transform_2(%arg0: i32) -> (i32, i32) {
    %c0_i32 = arith.constant 0 : i32
    %c0_i32_0 = arith.constant 0 : i32
    %c0_i32_1 = arith.constant 0 : i32
    return %c0_i32, %c0_i32_0 : i32, i32
  }
}

</mosaic_0001>

<bundles_post_ra>
// kernel: cam_loss_regressor_forward.1
= control target key start
LH: loop header
LB: loop body
LE: loop exit
PB: predicated region body
PF: predicated region fallthrough
CT: control target
= control target key end

     0   :  { %s67_s0 = inlined_call_operand.vmem [shape: f32[16,128], index: 0, kind: input, shape index: {}]   ;;  %s68_s1 = inlined_call_operand.vmem [shape: f32[16,128], index: 1, kind: input, shape index: {}]   ;;  %s69_s2 = inlined_call_operand.vmem [shape: f32[8,128], index: 2, kind: output, shape index: {}]  }
   0x1   :  { %v16_v0 = vld [vmem:[%s67_s0] sm:$0xff]  ;;  %v17_v1 = vld [vmem:[%s67_s0 + $0x8] sm:$0xff] }
   0x2   :  { %v18_v2 = vld [vmem:[%s68_s1] sm:$0xff]  ;;  %v19_v3 = vld [vmem:[%s68_s1 + $0x8] sm:$0xff] }
   0x3   :  { %v20_v4 = vsub.f32 %v16_v0, %v18_v2  ;;  %v21_v5 = vsub.f32 %v17_v1, %v19_v3 }
   0x5   :  { %v22_v6 = vmul.f32 %v20_v4, %v20_v4  ;;  %v23_v7 = vmul.f32 %v21_v5, %v21_v5 }
   0x7   :  { %v25_v8 = vadd.f32 %v23_v7, %v22_v6 }
   0x9   :  { %32 = vst [vmem:[%s69_s2] sm:$0xff] %v25_v8 }

</bundles_post_ra>
